<compile_context>
chip_gen: v7x
topology: tpu7x:2x2x1
jax: 0.10.0
libtpu: 0.0.40
codegen_flags: <defaults>
</compile_context>

<pallas_src>
import functools

import jax
import jax.numpy as jnp
from jax import lax
from jax.experimental import pallas as pl
from jax.experimental.pallas import tpu as pltpu


# -----------------------------------------------------------------------------
# Per-generation VMEM budgeting (v5e/v6e: 128 MiB physical, v7x: 64 MiB per TC)
# -----------------------------------------------------------------------------
def _vmem_physical_bytes():
    try:
        info = pltpu.get_tpu_info()
        nbytes = int(getattr(info, "vmem_capacity_bytes", 0))
        if nbytes > 0:
            return nbytes
    except Exception:
        pass
    return 64 * 1024 * 1024            # conservative fallback (v7x per-TensorCore)


def _vmem_cap():
    # ~75% of physical VMEM: headroom for Mosaic internal scratch and
    # unaccounted double buffers (v7x -> ~48 MiB, v5e/v6e -> ~96 MiB).
    return (_vmem_physical_bytes() * 3) // 4


def _vmem_limit(nbytes):
    cap = _vmem_cap()
    floor = min(32 * 1024 * 1024, cap)
    return int(min(max(int(nbytes), floor), cap))


# -----------------------------------------------------------------------------
# Kernel 1: LN1 + ToMeAttention + residual  (one batch element per grid step)
# -----------------------------------------------------------------------------
def _attn_block_kernel(x_ref, logsize_ref, ln1w_ref, ln1b_ref,
                       wqkv_ref, bqkv_ref, wproj_ref, bproj_ref, hsum_ref,
                       y_ref, metric_ref, o_sc,
                       *, num_heads, head_dim, use_prop_bias):
    x = x_ref[0]                                     # (N, D) f32
    N = x.shape[0]
    D = num_heads * head_dim

    # --- ln_1 (nn.LayerNorm, eps=1e-5, biased variance), f32 elementwise ---
    mu = jnp.mean(x, axis=-1, keepdims=True)
    var = jnp.mean((x - mu) ** 2, axis=-1, keepdims=True)
    xn = (x - mu) * lax.rsqrt(var + 1e-5)
    xn = xn * ln1w_ref[...] + ln1b_ref[...]          # (N, D) f32

    # --- fused qkv projection: xn @ Wqkv (pre-transposed, q-scale folded into
    # the q columns, bf16 weights) + bias.  Column layout: [q | k | v]. ---
    qkv = jnp.dot(xn.astype(jnp.bfloat16), wqkv_ref[...],
                  preferred_element_type=jnp.float32) + bqkv_ref[...]   # (N, 3D)

    # --- ToMe metric = k.mean(over heads), computed lane-dense (width >= 128)
    # with one tiny matmul against the precomputed head-sum matrix. ---
    k_flat = qkv[:, D:2 * D]
    metric_ref[0] = jnp.dot(k_flat.astype(jnp.bfloat16), hsum_ref[...],
                            preferred_element_type=jnp.float32)

    if use_prop_bias:
        # Hoist the key-axis log(size) broadcast once (JAX does not CSE it).
        bias = jnp.broadcast_to(logsize_ref[0], (N, N))                  # (N, N)

    for h in range(num_heads):
        lo = h * head_dim
        qh = qkv[:, lo:lo + head_dim].astype(jnp.bfloat16)
        kh = qkv[:, D + lo:D + lo + head_dim].astype(jnp.bfloat16)
        vh = qkv[:, 2 * D + lo:2 * D + lo + head_dim].astype(jnp.bfloat16)

        # scores = q @ k^T via dot_general (no explicit transpose materialized)
        s = lax.dot_general(qh, kh, (((1,), (1,)), ((), ())),
                            preferred_element_type=jnp.float32)          # (N, N)
        if use_prop_bias:
            s = s + bias                              # proportional attention
        # manual softmax: exp on EUP, normalization divide as approx reciprocal
        m = jnp.max(s, axis=-1, keepdims=True)
        p = jnp.exp(s - m)
        p = p * pl.reciprocal(jnp.sum(p, axis=-1, keepdims=True), approx=True)

        oh = jnp.dot(p.astype(jnp.bfloat16), vh,
                     preferred_element_type=jnp.float32)                 # (N, hd)
        # write the head output directly into the (N, D) bf16 scratch slab
        o_sc[:, lo:lo + head_dim] = oh.astype(jnp.bfloat16)

    # single fused output projection (K = D matmul on the assembled slab)
    attn_out = jnp.dot(o_sc[...], wproj_ref[...],
                       preferred_element_type=jnp.float32) + bproj_ref[...]

    y_ref[0] = x + attn_out                          # residual: x + attn(ln_1(x))


def attn_block_call(x, log_size_keys, kp, num_heads, use_prop_bias):
    B, N, D = x.shape
    hd = D // num_heads
    P = kp["hsum"].shape[1]                          # padded metric lane width

    kernel = functools.partial(_attn_block_kernel, num_heads=num_heads,
                               head_dim=hd, use_prop_bias=use_prop_bias)

    # VMEM estimate (weights counted double-buffered to stay conservative even
    # if Buffered(1) is not honored).
    wbytes = 2 * (D * 3 * D * 2 + D * D * 2 + D * P * 2) + (3 * D + 4 * D) * 4 * 2
    abytes = 2 * (2 * N * D * 4) + 2 * N * P * 4 + 2 * N * 4
    work = (N * 3 * D * 4 + N * D * 6                # qkv, xn f32+bf16
            + 3 * N * N * 4                          # scores / probs / bias
            + N * D * 2 + N * D * 4)                 # o_sc scratch, attn_out
    vmem_limit = _vmem_limit(wbytes + abytes + work + (6 << 20))

    w_buf = pl.Buffered(1)                           # grid-invariant weights
    return pl.pallas_call(
        kernel,
        out_shape=(jax.ShapeDtypeStruct((B, N, D), jnp.float32),
                   jax.ShapeDtypeStruct((B, N, P), jnp.float32)),
        grid=(B,),
        in_specs=[
            pl.BlockSpec((1, N, D), lambda b: (b, 0, 0)),                 # x
            pl.BlockSpec((1, 1, N), lambda b: (b, 0, 0)),                 # log(size)
            pl.BlockSpec((1, D), lambda b: (0, 0)),                       # ln1 w
            pl.BlockSpec((1, D), lambda b: (0, 0)),                       # ln1 b
            pl.BlockSpec((D, 3 * D), lambda b: (0, 0), pipeline_mode=w_buf),  # Wqkv
            pl.BlockSpec((1, 3 * D), lambda b: (0, 0)),                   # bqkv
            pl.BlockSpec((D, D), lambda b: (0, 0), pipeline_mode=w_buf),  # Wproj
            pl.BlockSpec((1, D), lambda b: (0, 0)),                       # bproj
            pl.BlockSpec((D, P), lambda b: (0, 0), pipeline_mode=w_buf),  # head-sum
        ],
        out_specs=(pl.BlockSpec((1, N, D), lambda b: (b, 0, 0)),
                   pl.BlockSpec((1, N, P), lambda b: (b, 0, 0))),
        scratch_shapes=[pltpu.VMEM((N, D), jnp.bfloat16)],                # o slab
        compiler_params=pltpu.CompilerParams(
            dimension_semantics=("parallel",),
            vmem_limit_bytes=vmem_limit),
    )(x, log_size_keys, kp["ln1_w"], kp["ln1_b"], kp["w_qkv_t"], kp["b_qkv"],
      kp["w_proj_t"], kp["b_proj"], kp["hsum"])


# -----------------------------------------------------------------------------
# Kernel 2: LN2 + MLP(c_fc -> QuickGELU -> c_proj) + residual
# Primary: weights resident in VMEM, grid over flattened (B*N) row tiles.
# Fallback: hidden dim streamed as a reduction axis when weights do not fit.
# -----------------------------------------------------------------------------
def _mlp_resident_kernel(x_ref, ln2w_ref, ln2b_ref, wfc_ref, bfc_ref,
                         wpr_ref, bpr_ref, o_ref):
    x = x_ref[...]                                   # (tn, D) f32
    mu = jnp.mean(x, axis=-1, keepdims=True)
    var = jnp.mean((x - mu) ** 2, axis=-1, keepdims=True)
    xn = (x - mu) * lax.rsqrt(var + 1e-5)
    xn = xn * ln2w_ref[...] + ln2b_ref[...]
    h = jnp.dot(xn.astype(jnp.bfloat16), wfc_ref[...],
                preferred_element_type=jnp.float32) + bfc_ref[...]
    h = h * jax.nn.sigmoid(1.702 * h)                # QuickGELU, f32
    o = jnp.dot(h.astype(jnp.bfloat16), wpr_ref[...],
                preferred_element_type=jnp.float32) + bpr_ref[...]
    o_ref[...] = x + o                               # residual


def _mlp_streamed_kernel(x_ref, ln2w_ref, ln2b_ref, wfc_ref, bfc_ref,
                         wpr_ref, bpr_ref, o_ref, acc_ref, xn_ref):
    j = pl.program_id(1)

    @pl.when(j == 0)
    def _():
        x = x_ref[...]
        mu = jnp.mean(x, axis=-1, keepdims=True)
        var = jnp.mean((x - mu) ** 2, axis=-1, keepdims=True)
        xn = (x - mu) * lax.rsqrt(var + 1e-5)
        xn = xn * ln2w_ref[...] + ln2b_ref[...]
        xn_ref[...] = xn.astype(jnp.bfloat16)
        acc_ref[...] = jnp.zeros_like(acc_ref)

    h = jnp.dot(xn_ref[...], wfc_ref[...],
                preferred_element_type=jnp.float32) + bfc_ref[...]
    h = h * jax.nn.sigmoid(1.702 * h)
    acc_ref[...] += jnp.dot(h.astype(jnp.bfloat16), wpr_ref[...],
                            preferred_element_type=jnp.float32)

    @pl.when(j == pl.num_programs(1) - 1)
    def _():
        o_ref[...] = x_ref[...] + acc_ref[...] + bpr_ref[...]


def mlp_block_call(y, kp):
    B, N, D = y.shape
    H = kp["w_fc_t"].shape[1]                        # = 4 * D
    R = B * N
    x2 = y.reshape(R, D)                             # flatten (B, N) -> rows

    cap = _vmem_cap()
    slack = 6 * 1024 * 1024
    wbytes = 2 * D * H * 2 + (H + 3 * D) * 4         # single-buffered bf16 weights

    def act_bytes(t):
        return (4 * t * D * 4                        # x in + o out, double-buffered
                + t * D * 6                          # xn f32 + bf16
                + t * H * 6                          # hidden f32 + bf16
                + t * D * 4)                         # o f32

    cands = [min(512, R)] + [t for t in (256, 128) if t < R]
    tn = None
    for t in cands:
        if wbytes + act_bytes(t) + slack <= cap:
            tn = t
            break

    w_buf = pl.Buffered(1)
    if tn is not None:
        # ---- resident path: weights DMA'd once per call ----
        grid = (pl.cdiv(R, tn),)
        vmem_limit = _vmem_limit(wbytes + act_bytes(tn) + slack)
        out = pl.pallas_call(
            _mlp_resident_kernel,
            out_shape=jax.ShapeDtypeStruct((R, D), jnp.float32),
            grid=grid,
            in_specs=[
                pl.BlockSpec((tn, D), lambda i: (i, 0)),                   # x rows
                pl.BlockSpec((1, D), lambda i: (0, 0)),                    # ln2 w
                pl.BlockSpec((1, D), lambda i: (0, 0)),                    # ln2 b
                pl.BlockSpec((D, H), lambda i: (0, 0), pipeline_mode=w_buf),  # c_fc
                pl.BlockSpec((1, H), lambda i: (0, 0)),                    # b_fc
                pl.BlockSpec((H, D), lambda i: (0, 0), pipeline_mode=w_buf),  # c_proj
                pl.BlockSpec((1, D), lambda i: (0, 0)),                    # b_proj
            ],
            out_specs=pl.BlockSpec((tn, D), lambda i: (i, 0)),
            compiler_params=pltpu.CompilerParams(
                dimension_semantics=("parallel",),
                vmem_limit_bytes=vmem_limit),
        )(x2, kp["ln2_w"], kp["ln2_b"], kp["w_fc_t"], kp["b_fc"],
          kp["w_mlp_proj_t"], kp["b_mlp_proj"])
    else:
        # ---- streamed fallback: hidden dim tiled as a reduction axis ----
        tn = min(256, R)
        th = H
        for cand in (2048, 1024, 512, 256, 128):     # largest 128-multiple divisor
            if H % cand == 0:
                th = cand
                break
        grid = (pl.cdiv(R, tn), H // th)
        step_bytes = (4 * tn * D * 4 + 2 * (D * th * 2 + th * D * 2)
                      + tn * th * 6 + tn * D * 6)
        vmem_limit = _vmem_limit(step_bytes + slack)
        out = pl.pallas_call(
            _mlp_streamed_kernel,
            out_shape=jax.ShapeDtypeStruct((R, D), jnp.float32),
            grid=grid,
            in_specs=[
                pl.BlockSpec((tn, D), lambda i, j: (i, 0)),
                pl.BlockSpec((1, D), lambda i, j: (0, 0)),
                pl.BlockSpec((1, D), lambda i, j: (0, 0)),
                pl.BlockSpec((D, th), lambda i, j: (0, j)),
                pl.BlockSpec((1, th), lambda i, j: (0, j)),
                pl.BlockSpec((th, D), lambda i, j: (j, 0)),
                pl.BlockSpec((1, D), lambda i, j: (0, 0)),
            ],
            out_specs=pl.BlockSpec((tn, D), lambda i, j: (i, 0)),
            scratch_shapes=[pltpu.VMEM((tn, D), jnp.float32),
                            pltpu.VMEM((tn, D), jnp.bfloat16)],
            compiler_params=pltpu.CompilerParams(
                dimension_semantics=("parallel", "arbitrary"),
                vmem_limit_bytes=vmem_limit),
        )(x2, kp["ln2_w"], kp["ln2_b"], kp["w_fc_t"], kp["b_fc"],
          kp["w_mlp_proj_t"], kp["b_mlp_proj"])

    return out.reshape(B, N, D)


# -----------------------------------------------------------------------------
# ToMe merging (plain-JAX glue: data-dependent argsort / gather / scatter-add)
# -----------------------------------------------------------------------------
def bipartite_soft_matching_jax(metric, r, class_token=False, distill_token=False):
    protected = int(class_token) + int(distill_token)
    t = metric.shape[1]
    r = min(r, (t - protected) // 2)
    if r <= 0:
        return None

    metric = metric / jnp.linalg.norm(metric, axis=-1, keepdims=True)
    a, b = metric[:, ::2, :], metric[:, 1::2, :]
    scores = jnp.einsum("bic,bjc->bij", a, b)
    if class_token:
        scores = scores.at[:, 0, :].set(-jnp.inf)
    if distill_token:
        scores = scores.at[:, :, 0].set(-jnp.inf)

    node_max = scores.max(axis=-1)
    node_idx = scores.argmax(axis=-1)
    edge_idx = jnp.argsort(-node_max, axis=-1)       # descending
    unm_idx = edge_idx[:, r:]
    src_idx = edge_idx[:, :r]
    dst_idx = jnp.take_along_axis(node_idx, src_idx, axis=-1)
    if class_token:
        unm_idx = jnp.sort(unm_idx, axis=1)

    def merge(x):                                    # mode="sum" (merge_wavg)
        src, dst = x[:, ::2, :], x[:, 1::2, :]
        n, t1, c = src.shape
        unm = jnp.take_along_axis(
            src, jnp.broadcast_to(unm_idx[..., None], (n, t1 - r, c)), axis=1)
        srcg = jnp.take_along_axis(
            src, jnp.broadcast_to(src_idx[..., None], (n, r, c)), axis=1)

        def scat(d, idx, s):
            return d.at[idx].add(s)                  # scatter_reduce(sum)
        dst = jax.vmap(scat)(dst, dst_idx, srcg)
        return jnp.concatenate([unm, dst], axis=1)

    return merge


def merge_wavg_jax(merge, x, size=None):
    if size is None:
        size = jnp.ones_like(x[..., :1])
    x = merge(x * size)
    size = merge(size)
    return x / size, size


# -----------------------------------------------------------------------------
# Parameter prep (layout plumbing: pre-transpose, fold q-scale, bf16 cast,
# precompute head-sum matrix).  Call ONCE per block and reuse across forwards.
# -----------------------------------------------------------------------------
def prepare_kernel_params(p, n_head):
    D = p["w_attn_proj"].shape[0]
    hd = D // n_head
    scale = float(hd) ** -0.5
    # fold the query scale into the q columns of the (pre-transposed) qkv weight/bias
    col_scale = jnp.concatenate(
        [jnp.full((D,), scale, jnp.float32), jnp.ones((2 * D,), jnp.float32)])
    w_qkv_t = p["w_qkv"].T * col_scale[None, :]            # (D, 3D)
    b_qkv = p["b_qkv"] * col_scale[None, :]                # (1, 3D)
    # head-sum matrix: (D, P) with hsum[h*hd + j, j] = 1/n_head, P = 128-padded hd
    P = ((hd + 127) // 128) * 128
    hsum = jax.nn.one_hot(jnp.arange(D) % hd, P, dtype=jnp.float32) / float(n_head)
    return {
        "ln1_w": p["ln1_w"], "ln1_b": p["ln1_b"],
        "w_qkv_t": w_qkv_t.astype(jnp.bfloat16),
        "b_qkv": b_qkv.astype(jnp.float32),
        "w_proj_t": p["w_attn_proj"].T.astype(jnp.bfloat16),     # (D, D)
        "b_proj": p["b_attn_proj"],
        "hsum": hsum.astype(jnp.bfloat16),                       # (D, P)
        "ln2_w": p["ln2_w"], "ln2_b": p["ln2_b"],
        "w_fc_t": p["w_fc"].T.astype(jnp.bfloat16),              # (D, 4D)
        "b_fc": p["b_fc"],
        "w_mlp_proj_t": p["w_mlp_proj"].T.astype(jnp.bfloat16),  # (4D, D)
        "b_mlp_proj": p["b_mlp_proj"],
    }


# -----------------------------------------------------------------------------
# Full forward (takes pre-prepared kernel params; x in LND like the module)
# -----------------------------------------------------------------------------
def tome_residual_attention_block(x_lnd, kp, n_head, tome_info, attn_mask=None):
    # TODO(synk): attn_mask is only dtype-cast in the reference forward and never
    # passed to ToMeAttention, so it is unused here as well.
    x = jnp.transpose(x_lnd, (1, 0, 2))              # LND -> BND (hoist in a real stack)
    B, N, D = x.shape
    hd = D // n_head

    use_prop_bias = bool(tome_info["prop_attn"]) and tome_info["size"] is not None
    if use_prop_bias:
        log_size_keys = jnp.log(
            jnp.transpose(tome_info["size"], (0, 2, 1)).astype(jnp.float32))  # (B,1,N)
    else:
        log_size_keys = jnp.zeros((B, 1, N), jnp.float32)   # never read in-kernel

    y, metric_p = attn_block_call(x, log_size_keys, kp, n_head, use_prop_bias)
    metric = metric_p[:, :, :hd]                     # un-pad lane-dense metric

    # NOTE: r is consumed from a Python list at trace time (mirrors the torch
    # module). Do not wrap this function in jax.jit; pass r statically instead.
    r = tome_info["r"].pop(0)
    if r > 0:
        merge = bipartite_soft_matching_jax(
            metric, r, tome_info["class_token"], tome_info["distill_token"])
        if merge is not None:
            # TODO(synk): trace_source / merge_source bookkeeping not implemented.
            y, tome_info["size"] = merge_wavg_jax(merge, y, tome_info["size"])

    out = mlp_block_call(y, kp)
    return jnp.transpose(out, (1, 0, 2))             # back to (seq, batch, d_model)


# -----------------------------------------------------------------------------
# Deterministic parameter construction + demo
# -----------------------------------------------------------------------------
def make_params(key, d_model):
    ks = jax.random.split(key, 12)
    H = 4 * d_model
    n = lambda k, shape, s: s * jax.random.normal(k, shape, jnp.float32)
    return {
        "ln1_w": (1.0 + n(ks[0], (1, d_model), 0.1)),
        "ln1_b": n(ks[1], (1, d_model), 0.1),
        "w_qkv": n(ks[2], (3 * d_model, d_model), 0.05),
        "b_qkv": n(ks[3], (1, 3 * d_model), 0.02),
        "w_attn_proj": n(ks[4], (d_model, d_model), 0.05),
        "b_attn_proj": n(ks[5], (1, d_model), 0.02),
        "ln2_w": (1.0 + n(ks[6], (1, d_model), 0.1)),
        "ln2_b": n(ks[7], (1, d_model), 0.1),
        "w_fc": n(ks[8], (H, d_model), 0.05),
        "b_fc": n(ks[9], (1, H), 0.02),
        "w_mlp_proj": n(ks[10], (d_model, H), 0.05),
        "b_mlp_proj": n(ks[11], (1, d_model), 0.02),
    }


if __name__ == "__main__":
    d_model, n_head, seq, batch = 32, 4, 8, 2
    key = jax.random.PRNGKey(0)
    k_x, k_p = jax.random.split(key)

    params = make_params(k_p, d_model)
    kp = prepare_kernel_params(params, n_head)       # prepared once, reused per call
    x = jax.random.normal(k_x, (seq, batch, d_model), jnp.float32)  # (L, N, D)

    tome_info = {
        "r": [2, 2],            # merge 2 tokens per block call
        "size": None,
        "prop_attn": True,
        "class_token": True,
        "distill_token": False,
        "trace_source": False,
        "source": None,
    }

    # first call: size=None (no proportional-attention bias)
    out1 = tome_residual_attention_block(x, kp, n_head, tome_info)
    # second call: exercises the prop-attn (log-size bias) path on merged tokens
    out2 = tome_residual_attention_block(out1, kp, n_head, tome_info)
    out2 = jax.block_until_ready(out2)

    assert out1.shape == (seq - 2, batch, d_model), out1.shape
    assert out2.shape == (seq - 4, batch, d_model), out2.shape
    assert jnp.all(jnp.isfinite(out1))
    assert jnp.all(jnp.isfinite(out2))
    print("KERNEL_OK")
</pallas_src>

<mosaic_0001>
module attributes {stable_mosaic.version = 11 : i64} {
  func.func @_attn_block_kernel(%arg0: i32, %arg1: memref<1x8x32xf32, #tpu.memory_space<vmem>>, %arg2: memref<1x1x8xf32, #tpu.memory_space<vmem>>, %arg3: memref<1x32xf32, #tpu.memory_space<vmem>>, %arg4: memref<1x32xf32, #tpu.memory_space<vmem>>, %arg5: memref<32x96xbf16, #tpu.memory_space<vmem>>, %arg6: memref<1x96xf32, #tpu.memory_space<vmem>>, %arg7: memref<32x32xbf16, #tpu.memory_space<vmem>>, %arg8: memref<1x32xf32, #tpu.memory_space<vmem>>, %arg9: memref<32x128xbf16, #tpu.memory_space<vmem>>, %arg10: memref<1x8x32xf32, #tpu.memory_space<vmem>>, %arg11: memref<1x8x128xf32, #tpu.memory_space<vmem>>, %arg12: memref<8x32xbf16, #tpu.memory_space<vmem>>) attributes {dimension_semantics = [#tpu.dimension_semantics<parallel>], iteration_bounds = array<i64: 2>, scalar_prefetch = 0 : i64, scratch_operands = 1 : i64, tpu.core_type = #tpu.core_type<tc>, window_params = [{transform_indices = @transform_0, window_bounds = array<i64: 1, 8, 32>}, {transform_indices = @transform_1, window_bounds = array<i64: 1, 1, 8>}, {pipeline_mode = #tpu.pipeline_mode<synchronous>, transform_indices = @transform_2, window_bounds = array<i64: 1, 32>}, {pipeline_mode = #tpu.pipeline_mode<synchronous>, transform_indices = @transform_3, window_bounds = array<i64: 1, 32>}, {pipeline_mode = #tpu.pipeline_mode<synchronous>, transform_indices = @transform_4, window_bounds = array<i64: 32, 96>}, {pipeline_mode = #tpu.pipeline_mode<synchronous>, transform_indices = @transform_5, window_bounds = array<i64: 1, 96>}, {pipeline_mode = #tpu.pipeline_mode<synchronous>, transform_indices = @transform_6, window_bounds = array<i64: 32, 32>}, {pipeline_mode = #tpu.pipeline_mode<synchronous>, transform_indices = @transform_7, window_bounds = array<i64: 1, 32>}, {pipeline_mode = #tpu.pipeline_mode<synchronous>, transform_indices = @transform_8, window_bounds = array<i64: 32, 128>}, {transform_indices = @transform_9, window_bounds = array<i64: 1, 8, 32>}, {transform_indices = @transform_10, window_bounds = array<i64: 1, 8, 128>}]} {
    %c0 = arith.constant 0 : index
    %c0_0 = arith.constant 0 : index
    %c0_1 = arith.constant 0 : index
    %0 = vector.load %arg1[%c0, %c0_0, %c0_1] : memref<1x8x32xf32, #tpu.memory_space<vmem>>, vector<1x8x32xf32>
    %1 = vector.shape_cast %0 : vector<1x8x32xf32> to vector<8x32xf32>
    %cst = arith.constant dense<0.000000e+00> : vector<8xf32>
    %2 = vector.multi_reduction <add>, %1, %cst [1] : vector<8x32xf32> to vector<8xf32>
    %3 = vector.shape_cast %2 : vector<8xf32> to vector<8x1xf32>
    %cst_2 = arith.constant 3.200000e+01 : f32
    %4 = vector.broadcast %cst_2 : f32 to vector<8x1xf32>
    %5 = arith.divf %3, %4 : vector<8x1xf32>
    %6 = vector.broadcast %5 : vector<8x1xf32> to vector<8x32xf32>
    %7 = arith.subf %1, %6 : vector<8x32xf32>
    %8 = arith.mulf %7, %7 : vector<8x32xf32>
    %cst_3 = arith.constant dense<0.000000e+00> : vector<8xf32>
    %9 = vector.multi_reduction <add>, %8, %cst_3 [1] : vector<8x32xf32> to vector<8xf32>
    %10 = vector.shape_cast %9 : vector<8xf32> to vector<8x1xf32>
    %cst_4 = arith.constant 3.200000e+01 : f32
    %11 = vector.broadcast %cst_4 : f32 to vector<8x1xf32>
    %12 = arith.divf %10, %11 : vector<8x1xf32>
    %13 = vector.broadcast %5 : vector<8x1xf32> to vector<8x32xf32>
    %14 = arith.subf %1, %13 : vector<8x32xf32>
    %cst_5 = arith.constant 9.99999974E-6 : f32
    %15 = vector.broadcast %cst_5 : f32 to vector<8x1xf32>
    %16 = arith.addf %12, %15 : vector<8x1xf32>
    %17 = math.rsqrt %16 : vector<8x1xf32>
    %18 = vector.broadcast %17 : vector<8x1xf32> to vector<8x32xf32>
    %19 = arith.mulf %14, %18 : vector<8x32xf32>
    %c0_6 = arith.constant 0 : index
    %c0_7 = arith.constant 0 : index
    %20 = vector.load %arg3[%c0_6, %c0_7] : memref<1x32xf32, #tpu.memory_space<vmem>>, vector<1x32xf32>
    %21 = vector.broadcast %20 : vector<1x32xf32> to vector<8x32xf32>
    %22 = arith.mulf %19, %21 : vector<8x32xf32>
    %c0_8 = arith.constant 0 : index
    %c0_9 = arith.constant 0 : index
    %23 = vector.load %arg4[%c0_8, %c0_9] : memref<1x32xf32, #tpu.memory_space<vmem>>, vector<1x32xf32>
    %24 = vector.broadcast %23 : vector<1x32xf32> to vector<8x32xf32>
    %25 = arith.addf %22, %24 : vector<8x32xf32>
    %26 = arith.truncf %25 : vector<8x32xf32> to vector<8x32xbf16>
    %c0_10 = arith.constant 0 : index
    %c0_11 = arith.constant 0 : index
    %27 = vector.load %arg5[%c0_10, %c0_11] : memref<32x96xbf16, #tpu.memory_space<vmem>>, vector<32x96xbf16>
    %cst_12 = arith.constant dense<0.000000e+00> : vector<8x96xf32>
    %28 = tpu.matmul %26, %27, %cst_12 {dimension_numbers = #tpu.dot_dimension_numbers<[1], [0], [0], [1], [0, 0, 1, 1], [], []>} : vector<8x32xbf16>, vector<32x96xbf16>, vector<8x96xf32> -> vector<8x96xf32>
    %c0_13 = arith.constant 0 : index
    %c0_14 = arith.constant 0 : index
    %29 = vector.load %arg6[%c0_13, %c0_14] : memref<1x96xf32, #tpu.memory_space<vmem>>, vector<1x96xf32>
    %30 = vector.broadcast %29 : vector<1x96xf32> to vector<8x96xf32>
    %31 = arith.addf %28, %30 : vector<8x96xf32>
    %32 = vector.extract_strided_slice %31 {offsets = [0, 32], sizes = [8, 32], strides = [1, 1]} : vector<8x96xf32> to vector<8x32xf32>
    %33 = arith.truncf %32 : vector<8x32xf32> to vector<8x32xbf16>
    %c0_15 = arith.constant 0 : index
    %c0_16 = arith.constant 0 : index
    %34 = vector.load %arg9[%c0_15, %c0_16] : memref<32x128xbf16, #tpu.memory_space<vmem>>, vector<32x128xbf16>
    %cst_17 = arith.constant dense<0.000000e+00> : vector<8x128xf32>
    %35 = tpu.matmul %33, %34, %cst_17 {dimension_numbers = #tpu.dot_dimension_numbers<[1], [0], [0], [1], [0, 0, 1, 1], [], []>} : vector<8x32xbf16>, vector<32x128xbf16>, vector<8x128xf32> -> vector<8x128xf32>
    %c0_18 = arith.constant 0 : index
    %c0_19 = arith.constant 0 : index
    %c0_20 = arith.constant 0 : index
    %36 = vector.load %arg11[%c0_18, %c0_19, %c0_20] : memref<1x8x128xf32, #tpu.memory_space<vmem>>, vector<1x8x128xf32>
    %37 = vector.shape_cast %36 : vector<1x8x128xf32> to vector<8x128xf32>
    %38 = vector.shape_cast %35 : vector<8x128xf32> to vector<1x8x128xf32>
    tpu.vector_store %arg11[%c0_18, %c0_19, %c0_20], %38 {strides = array<i32>} : memref<1x8x128xf32, #tpu.memory_space<vmem>>, vector<1x8x128xf32>,
    %39 = vector.extract_strided_slice %31 {offsets = [0, 0], sizes = [8, 8], strides = [1, 1]} : vector<8x96xf32> to vector<8x8xf32>
    %40 = arith.truncf %39 : vector<8x8xf32> to vector<8x8xbf16>
    %41 = vector.extract_strided_slice %31 {offsets = [0, 32], sizes = [8, 8], strides = [1, 1]} : vector<8x96xf32> to vector<8x8xf32>
    %42 = arith.truncf %41 : vector<8x8xf32> to vector<8x8xbf16>
    %43 = vector.extract_strided_slice %31 {offsets = [0, 64], sizes = [8, 8], strides = [1, 1]} : vector<8x96xf32> to vector<8x8xf32>
    %44 = arith.truncf %43 : vector<8x8xf32> to vector<8x8xbf16>
    %cst_21 = arith.constant dense<0.000000e+00> : vector<8x8xf32>
    %45 = tpu.matmul %40, %42, %cst_21 {dimension_numbers = #tpu.dot_dimension_numbers<[1], [1], [0], [0], [0, 0, 1, 0], [], []>} : vector<8x8xbf16>, vector<8x8xbf16>, vector<8x8xf32> -> vector<8x8xf32>
    %cst_22 = arith.constant dense<0xFF800000> : vector<8xf32>
    %46 = vector.multi_reduction <maximumf>, %45, %cst_22 [1] : vector<8x8xf32> to vector<8xf32>
    %47 = vector.shape_cast %46 : vector<8xf32> to vector<8x1xf32>
    %48 = vector.broadcast %47 : vector<8x1xf32> to vector<8x8xf32>
    %49 = arith.subf %45, %48 : vector<8x8xf32>
    %50 = math.exp %49 : vector<8x8xf32>
    %cst_23 = arith.constant dense<0.000000e+00> : vector<8xf32>
    %51 = vector.multi_reduction <add>, %50, %cst_23 [1] : vector<8x8xf32> to vector<8xf32>
    %52 = vector.shape_cast %51 : vector<8xf32> to vector<8x1xf32>
    %53 = tpu.reciprocal %52 {approx = true} : vector<8x1xf32> -> vector<8x1xf32>
    %54 = vector.broadcast %53 : vector<8x1xf32> to vector<8x8xf32>
    %55 = arith.mulf %50, %54 : vector<8x8xf32>
    %56 = arith.truncf %55 : vector<8x8xf32> to vector<8x8xbf16>
    %cst_24 = arith.constant dense<0.000000e+00> : vector<8x8xf32>
    %57 = tpu.matmul %56, %44, %cst_24 {dimension_numbers = #tpu.dot_dimension_numbers<[1], [0], [0], [1], [0, 0, 1, 1], [], []>} : vector<8x8xbf16>, vector<8x8xbf16>, vector<8x8xf32> -> vector<8x8xf32>
    %58 = arith.truncf %57 : vector<8x8xf32> to vector<8x8xbf16>
    %c0_25 = arith.constant 0 : index
    %c0_26 = arith.constant 0 : index
    %59 = vector.load %arg12[%c0_25, %c0_26] : memref<8x32xbf16, #tpu.memory_space<vmem>>, vector<8x8xbf16>
    tpu.vector_store %arg12[%c0_25, %c0_26], %58 {strides = array<i32>} : memref<8x32xbf16, #tpu.memory_space<vmem>>, vector<8x8xbf16>,
    %60 = vector.extract_strided_slice %31 {offsets = [0, 8], sizes = [8, 8], strides = [1, 1]} : vector<8x96xf32> to vector<8x8xf32>
    %61 = arith.truncf %60 : vector<8x8xf32> to vector<8x8xbf16>
    %62 = vector.extract_strided_slice %31 {offsets = [0, 40], sizes = [8, 8], strides = [1, 1]} : vector<8x96xf32> to vector<8x8xf32>
    %63 = arith.truncf %62 : vector<8x8xf32> to vector<8x8xbf16>
    %64 = vector.extract_strided_slice %31 {offsets = [0, 72], sizes = [8, 8], strides = [1, 1]} : vector<8x96xf32> to vector<8x8xf32>
    %65 = arith.truncf %64 : vector<8x8xf32> to vector<8x8xbf16>
    %cst_27 = arith.constant dense<0.000000e+00> : vector<8x8xf32>
    %66 = tpu.matmul %61, %63, %cst_27 {dimension_numbers = #tpu.dot_dimension_numbers<[1], [1], [0], [0], [0, 0, 1, 0], [], []>} : vector<8x8xbf16>, vector<8x8xbf16>, vector<8x8xf32> -> vector<8x8xf32>
    %cst_28 = arith.constant dense<0xFF800000> : vector<8xf32>
    %67 = vector.multi_reduction <maximumf>, %66, %cst_28 [1] : vector<8x8xf32> to vector<8xf32>
    %68 = vector.shape_cast %67 : vector<8xf32> to vector<8x1xf32>
    %69 = vector.broadcast %68 : vector<8x1xf32> to vector<8x8xf32>
    %70 = arith.subf %66, %69 : vector<8x8xf32>
    %71 = math.exp %70 : vector<8x8xf32>
    %cst_29 = arith.constant dense<0.000000e+00> : vector<8xf32>
    %72 = vector.multi_reduction <add>, %71, %cst_29 [1] : vector<8x8xf32> to vector<8xf32>
    %73 = vector.shape_cast %72 : vector<8xf32> to vector<8x1xf32>
    %74 = tpu.reciprocal %73 {approx = true} : vector<8x1xf32> -> vector<8x1xf32>
    %75 = vector.broadcast %74 : vector<8x1xf32> to vector<8x8xf32>
    %76 = arith.mulf %71, %75 : vector<8x8xf32>
    %77 = arith.truncf %76 : vector<8x8xf32> to vector<8x8xbf16>
    %cst_30 = arith.constant dense<0.000000e+00> : vector<8x8xf32>
    %78 = tpu.matmul %77, %65, %cst_30 {dimension_numbers = #tpu.dot_dimension_numbers<[1], [0], [0], [1], [0, 0, 1, 1], [], []>} : vector<8x8xbf16>, vector<8x8xbf16>, vector<8x8xf32> -> vector<8x8xf32>
    %79 = arith.truncf %78 : vector<8x8xf32> to vector<8x8xbf16>
    %c0_31 = arith.constant 0 : index
    %c8 = arith.constant 8 : index
    %80 = vector.load %arg12[%c0_31, %c8] : memref<8x32xbf16, #tpu.memory_space<vmem>>, vector<8x8xbf16>
    tpu.vector_store %arg12[%c0_31, %c8], %79 {strides = array<i32>} : memref<8x32xbf16, #tpu.memory_space<vmem>>, vector<8x8xbf16>,
    %81 = vector.extract_strided_slice %31 {offsets = [0, 16], sizes = [8, 8], strides = [1, 1]} : vector<8x96xf32> to vector<8x8xf32>
    %82 = arith.truncf %81 : vector<8x8xf32> to vector<8x8xbf16>
    %83 = vector.extract_strided_slice %31 {offsets = [0, 48], sizes = [8, 8], strides = [1, 1]} : vector<8x96xf32> to vector<8x8xf32>
    %84 = arith.truncf %83 : vector<8x8xf32> to vector<8x8xbf16>
    %85 = vector.extract_strided_slice %31 {offsets = [0, 80], sizes = [8, 8], strides = [1, 1]} : vector<8x96xf32> to vector<8x8xf32>
    %86 = arith.truncf %85 : vector<8x8xf32> to vector<8x8xbf16>
    %cst_32 = arith.constant dense<0.000000e+00> : vector<8x8xf32>
    %87 = tpu.matmul %82, %84, %cst_32 {dimension_numbers = #tpu.dot_dimension_numbers<[1], [1], [0], [0], [0, 0, 1, 0], [], []>} : vector<8x8xbf16>, vector<8x8xbf16>, vector<8x8xf32> -> vector<8x8xf32>
    %cst_33 = arith.constant dense<0xFF800000> : vector<8xf32>
    %88 = vector.multi_reduction <maximumf>, %87, %cst_33 [1] : vector<8x8xf32> to vector<8xf32>
    %89 = vector.shape_cast %88 : vector<8xf32> to vector<8x1xf32>
    %90 = vector.broadcast %89 : vector<8x1xf32> to vector<8x8xf32>
    %91 = arith.subf %87, %90 : vector<8x8xf32>
    %92 = math.exp %91 : vector<8x8xf32>
    %cst_34 = arith.constant dense<0.000000e+00> : vector<8xf32>
    %93 = vector.multi_reduction <add>, %92, %cst_34 [1] : vector<8x8xf32> to vector<8xf32>
    %94 = vector.shape_cast %93 : vector<8xf32> to vector<8x1xf32>
    %95 = tpu.reciprocal %94 {approx = true} : vector<8x1xf32> -> vector<8x1xf32>
    %96 = vector.broadcast %95 : vector<8x1xf32> to vector<8x8xf32>
    %97 = arith.mulf %92, %96 : vector<8x8xf32>
    %98 = arith.truncf %97 : vector<8x8xf32> to vector<8x8xbf16>
    %cst_35 = arith.constant dense<0.000000e+00> : vector<8x8xf32>
    %99 = tpu.matmul %98, %86, %cst_35 {dimension_numbers = #tpu.dot_dimension_numbers<[1], [0], [0], [1], [0, 0, 1, 1], [], []>} : vector<8x8xbf16>, vector<8x8xbf16>, vector<8x8xf32> -> vector<8x8xf32>
    %100 = arith.truncf %99 : vector<8x8xf32> to vector<8x8xbf16>
    %c0_36 = arith.constant 0 : index
    %c16 = arith.constant 16 : index
    %101 = vector.load %arg12[%c0_36, %c16] : memref<8x32xbf16, #tpu.memory_space<vmem>>, vector<8x8xbf16>
    tpu.vector_store %arg12[%c0_36, %c16], %100 {strides = array<i32>} : memref<8x32xbf16, #tpu.memory_space<vmem>>, vector<8x8xbf16>,
    %102 = vector.extract_strided_slice %31 {offsets = [0, 24], sizes = [8, 8], strides = [1, 1]} : vector<8x96xf32> to vector<8x8xf32>
    %103 = arith.truncf %102 : vector<8x8xf32> to vector<8x8xbf16>
    %104 = vector.extract_strided_slice %31 {offsets = [0, 56], sizes = [8, 8], strides = [1, 1]} : vector<8x96xf32> to vector<8x8xf32>
    %105 = arith.truncf %104 : vector<8x8xf32> to vector<8x8xbf16>
    %106 = vector.extract_strided_slice %31 {offsets = [0, 88], sizes = [8, 8], strides = [1, 1]} : vector<8x96xf32> to vector<8x8xf32>
    %107 = arith.truncf %106 : vector<8x8xf32> to vector<8x8xbf16>
    %cst_37 = arith.constant dense<0.000000e+00> : vector<8x8xf32>
    %108 = tpu.matmul %103, %105, %cst_37 {dimension_numbers = #tpu.dot_dimension_numbers<[1], [1], [0], [0], [0, 0, 1, 0], [], []>} : vector<8x8xbf16>, vector<8x8xbf16>, vector<8x8xf32> -> vector<8x8xf32>
    %cst_38 = arith.constant dense<0xFF800000> : vector<8xf32>
    %109 = vector.multi_reduction <maximumf>, %108, %cst_38 [1] : vector<8x8xf32> to vector<8xf32>
    %110 = vector.shape_cast %109 : vector<8xf32> to vector<8x1xf32>
    %111 = vector.broadcast %110 : vector<8x1xf32> to vector<8x8xf32>
    %112 = arith.subf %108, %111 : vector<8x8xf32>
    %113 = math.exp %112 : vector<8x8xf32>
    %cst_39 = arith.constant dense<0.000000e+00> : vector<8xf32>
    %114 = vector.multi_reduction <add>, %113, %cst_39 [1] : vector<8x8xf32> to vector<8xf32>
    %115 = vector.shape_cast %114 : vector<8xf32> to vector<8x1xf32>
    %116 = tpu.reciprocal %115 {approx = true} : vector<8x1xf32> -> vector<8x1xf32>
    %117 = vector.broadcast %116 : vector<8x1xf32> to vector<8x8xf32>
    %118 = arith.mulf %113, %117 : vector<8x8xf32>
    %119 = arith.truncf %118 : vector<8x8xf32> to vector<8x8xbf16>
    %cst_40 = arith.constant dense<0.000000e+00> : vector<8x8xf32>
    %120 = tpu.matmul %119, %107, %cst_40 {dimension_numbers = #tpu.dot_dimension_numbers<[1], [0], [0], [1], [0, 0, 1, 1], [], []>} : vector<8x8xbf16>, vector<8x8xbf16>, vector<8x8xf32> -> vector<8x8xf32>
    %121 = arith.truncf %120 : vector<8x8xf32> to vector<8x8xbf16>
    %c0_41 = arith.constant 0 : index
    %c24 = arith.constant 24 : index
    %122 = vector.load %arg12[%c0_41, %c24] : memref<8x32xbf16, #tpu.memory_space<vmem>>, vector<8x8xbf16>
    tpu.vector_store %arg12[%c0_41, %c24], %121 {strides = array<i32>} : memref<8x32xbf16, #tpu.memory_space<vmem>>, vector<8x8xbf16>,
    %c0_42 = arith.constant 0 : index
    %c0_43 = arith.constant 0 : index
    %123 = vector.load %arg12[%c0_42, %c0_43] : memref<8x32xbf16, #tpu.memory_space<vmem>>, vector<8x32xbf16>
    %c0_44 = arith.constant 0 : index
    %c0_45 = arith.constant 0 : index
    %124 = vector.load %arg7[%c0_44, %c0_45] : memref<32x32xbf16, #tpu.memory_space<vmem>>, vector<32x32xbf16>
    %cst_46 = arith.constant dense<0.000000e+00> : vector<8x32xf32>
    %125 = tpu.matmul %123, %124, %cst_46 {dimension_numbers = #tpu.dot_dimension_numbers<[1], [0], [0], [1], [0, 0, 1, 1], [], []>} : vector<8x32xbf16>, vector<32x32xbf16>, vector<8x32xf32> -> vector<8x32xf32>
    %c0_47 = arith.constant 0 : index
    %c0_48 = arith.constant 0 : index
    %126 = vector.load %arg8[%c0_47, %c0_48] : memref<1x32xf32, #tpu.memory_space<vmem>>, vector<1x32xf32>
    %127 = vector.broadcast %126 : vector<1x32xf32> to vector<8x32xf32>
    %128 = arith.addf %125, %127 : vector<8x32xf32>
    %129 = arith.addf %1, %128 : vector<8x32xf32>
    %c0_49 = arith.constant 0 : index
    %c0_50 = arith.constant 0 : index
    %c0_51 = arith.constant 0 : index
    %130 = vector.load %arg10[%c0_49, %c0_50, %c0_51] : memref<1x8x32xf32, #tpu.memory_space<vmem>>, vector<1x8x32xf32>
    %131 = vector.shape_cast %130 : vector<1x8x32xf32> to vector<8x32xf32>
    %132 = vector.shape_cast %129 : vector<8x32xf32> to vector<1x8x32xf32>
    tpu.vector_store %arg10[%c0_49, %c0_50, %c0_51], %132 {strides = array<i32>} : memref<1x8x32xf32, #tpu.memory_space<vmem>>, vector<1x8x32xf32>,
    return
  }
  func.func @transform_0(%arg0: i32) -> (i32, i32, i32) {
    %c0_i32 = arith.constant 0 : i32
    %c0_i32_0 = arith.constant 0 : i32
    %c0_i32_1 = arith.constant 0 : i32
    return %arg0, %c0_i32, %c0_i32_0 : i32, i32, i32
  }
  func.func @transform_1(%arg0: i32) -> (i32, i32, i32) {
    %c0_i32 = arith.constant 0 : i32
    %c0_i32_0 = arith.constant 0 : i32
    %c0_i32_1 = arith.constant 0 : i32
    return %arg0, %c0_i32, %c0_i32_0 : i32, i32, i32
  }
  func.func @transform_2(%arg0: i32) -> (i32, i32) {
    %c0_i32 = arith.constant 0 : i32
    %c0_i32_0 = arith.constant 0 : i32
    %c0_i32_1 = arith.constant 0 : i32
    return %c0_i32, %c0_i32_0 : i32, i32
  }
  func.func @transform_3(%arg0: i32) -> (i32, i32) {
    %c0_i32 = arith.constant 0 : i32
    %c0_i32_0 = arith.constant 0 : i32
    %c0_i32_1 = arith.constant 0 : i32
    return %c0_i32, %c0_i32_0 : i32, i32
  }
  func.func @transform_4(%arg0: i32) -> (i32, i32) {
    %c0_i32 = arith.constant 0 : i32
    %c0_i32_0 = arith.constant 0 : i32
    %c0_i32_1 = arith.constant 0 : i32
    return %c0_i32, %c0_i32_0 : i32, i32
  }
  func.func @transform_5(%arg0: i32) -> (i32, i32) {
    %c0_i32 = arith.constant 0 : i32
    %c0_i32_0 = arith.constant 0 : i32
    %c0_i32_1 = arith.constant 0 : i32
    return %c0_i32, %c0_i32_0 : i32, i32
  }
  func.func @transform_6(%arg0: i32) -> (i32, i32) {
    %c0_i32 = arith.constant 0 : i32
    %c0_i32_0 = arith.constant 0 : i32
    %c0_i32_1 = arith.constant 0 : i32
    return %c0_i32, %c0_i32_0 : i32, i32
  }
  func.func @transform_7(%arg0: i32) -> (i32, i32) {
    %c0_i32 = arith.constant 0 : i32
    %c0_i32_0 = arith.constant 0 : i32
    %c0_i32_1 = arith.constant 0 : i32
    return %c0_i32, %c0_i32_0 : i32, i32
  }
  func.func @transform_8(%arg0: i32) -> (i32, i32) {
    %c0_i32 = arith.constant 0 : i32
    %c0_i32_0 = arith.constant 0 : i32
    %c0_i32_1 = arith.constant 0 : i32
    return %c0_i32, %c0_i32_0 : i32, i32
  }
  func.func @transform_9(%arg0: i32) -> (i32, i32, i32) {
    %c0_i32 = arith.constant 0 : i32
    %c0_i32_0 = arith.constant 0 : i32
    %c0_i32_1 = arith.constant 0 : i32
    return %arg0, %c0_i32, %c0_i32_0 : i32, i32, i32
  }
  func.func @transform_10(%arg0: i32) -> (i32, i32, i32) {
    %c0_i32 = arith.constant 0 : i32
    %c0_i32_0 = arith.constant 0 : i32
    %c0_i32_1 = arith.constant 0 : i32
    return %arg0, %c0_i32, %c0_i32_0 : i32, i32, i32
  }
}

</mosaic_0001>

<bundles_post_ra>
// kernel: tpu_custom_call.1
= control target key start
LH: loop header
LB: loop body
LE: loop exit
PB: predicated region body
PF: predicated region fallthrough
CT: control target
= control target key end

     0   :  { %s2183_s0 = inlined_call_operand.hbm [shape: f32[2,8,32], index: 0, kind: input, shape index: {}]   ;;  %s2184_s1 = inlined_call_operand.vmem [shape: f32[2,1,8], index: 1, kind: input, shape index: {}]   ;;  %s2185_s2 = inlined_call_operand.vmem [shape: f32[1,32], index: 2, kind: input, shape index: {}]   ;;  %s2186_s3 = inlined_call_operand.vmem [shape: f32[1,32], index: 3, kind: input, shape index: {}]   ;;  %s2187_s4 = inlined_call_operand.hbm [shape: bf16[32,96], index: 4, kind: input, shape index: {}]   ;;  %s2188_s5 = inlined_call_operand.vmem [shape: f32[1,96], index: 5, kind: input, shape index: {}]   ;;  %s2189_s6 = inlined_call_operand.vmem [shape: bf16[32,32], index: 6, kind: input, shape index: {}]   ;;  %s2190_s7 = inlined_call_operand.vmem [shape: f32[1,32], index: 7, kind: input, shape index: {}]   ;;  %s2191_s8 = inlined_call_operand.hbm [shape: bf16[32,128], index: 8, kind: input, shape index: {}]   ;;  %s2192_s9 = inlined_call_operand.hbm [shape: f32[2,8,32], index: 9, kind: output, shape index: {0}]   ;;  %s2193_s10 = inlined_call_operand.hbm [shape: f32[2,8,128], index: 10, kind: output, shape index: {1}]  }
   0x1   :  { %2199 = sst [smem:[#allocation17_spill]] %s2183_s0 }
   0x2   :  { %2200 = sst [smem:[#allocation18_spill]] %s2185_s2 }
   0x3   :  { %16 = vsyncpa [#allocation4], 0 }
   0x4   :  { %18 = vsyncpa [#allocation4 + $0x1], 0 }
   0x5   :  { %19 = vsyncpa [#allocation7], 0 }
   0x6   :  { %20 = vsyncpa [#allocation5], 0 }
   0x7   :  { %22 = vsyncpa [#allocation5 + $0x1], 0 }
   0x8   :  { %23 = vsyncpa [#allocation11], 0 }
   0x9   :  { %25 = vsyncpa [#allocation11 + $0x1], 0  ;;  %s1816_s12 = smov 0   ;;  %s1818_s13 = smov 0  }
   0xa   :  { %s1820_s14 = smov 0   ;;  %s1822_s15 = smov 0  }
   0xb LB: > { %s1837_s16 = sadd.s32 4294967295, %s1736_s15   ;;  %s1291_s17 = sadd.s32 4294967294, %s1736_s15   ;;  %s1736_s15 = sphi %s1822_s15, %s2222_s15   ;;  %s1732_s14 = sphi %s1820_s14, %s2221_s14   ;;  %s1728_s13 = sphi %s1818_s13, %s2220_s13   ;;  %s1724_s12 = sphi %s1816_s12, %s2219_s12  }
   0xc   : > { %p51_p0 = scmp.ne.s32.totalorder %s1728_s13, %s1724_s12  ;;  %p2194_p1 = scmp.eq.s32.totalorder %s1837_s16, 0 }
   0xd   : > { %p254_p3 = scmp.eq.s32.totalorder %s1291_s17, 1  ;;  %p1292_p5 = scmp.ge.s32.totalorder %s1736_s15, 1 }
   0xe   : > { %p1846_p4 = por %p2194_p1, %p51_p0  ;;  %p287_p7 = scmp.lt.s32.totalorder %s1736_s15, 3 }
   0xf   : > { %p1851_p6 = por %p254_p3, %p51_p0  ;;  %s1738_s21 = smov [#allocation6]  }
  0x10   : > { %s2201_s18 = scalar_select %p1846_p4, 1, 0 }
  0x11   : > { %s2202_s19 = scalar_select %p1851_p6, 1, 0 }
  0x12   : > { %p1856_p8 = pnand %p1292_p5, %p287_p7  ;;  %s305_s22 = sshll.u32 %s1738_s21, 4  ;;  %s1860_s22 = int_to_ptr.vmem [resolvable:$true] %s305_s22 }
  0x13   : > { %2203 = sst [smem:[#allocation16_spill]] %s2202_s19  ;;  %s1739_s24 = smov [#allocation8]  }
  0x14   : > { %p1448_p9 = pneg %p1856_p8  ;;  %s327_s25 = sshll.u32 %s1739_s24, 4  ;;  %s1871_s25 = int_to_ptr.vmem [resolvable:$true] %s327_s25 }
  0x15   : > { %s1548_s1 = scalar_lea.hbm %s2187_s4, 256 }
  0x16   : > { %p1867_p11 = pnand %p1448_p9, %p2194_p1  ;;  %p1549_p12 = scmp.ne.s32.totalorder %s2187_s4, %s1548_s1 }
  0x17   : > { %p1555_p5 = scmp.lt.u32.totalorder %s1548_s1, %s2187_s4 }
  0x18   : > { %p1550_p13 = pneg %p1867_p11 }
  0x1a   : > { %p1551_p0 = pnand %p1550_p13, %p1549_p12 }
  0x1c   : > { %p1552_p3 = pneg %p1551_p0 }
  0x1e   : > { %p1557_p7 = pnand %p1555_p5, %p1552_p3 }
  0x20   : > { %1560 = shalt.err (!%p1557_p7)
}
  0x21   : > { %s1561_s17 = scalar_lea.vmem %s1860_s22, 256  ;;  %p1569_p2 = scmp.lt.s32.totalorder %s1860_s22, %s1860_s22 }
  0x22   : > { %p1562_p9 = scmp.ne.s32.totalorder %s1860_s22, %s1561_s17  ;;  %p1570_p12 = scmp.lt.s32.totalorder %s1561_s17, %s1561_s17 }
  0x24   : > { %p1564_p10 = pnand %p1562_p9, %p1550_p13  ;;  %p1571_p0 = por %p1570_p12, %p1569_p2 }
  0x26   : > { %p1565_p1 = pneg %p1564_p10 }
  0x28   : > { %p1572_p6 = pnand %p1571_p0, %p1565_p1 }
  0x2a   : > { %1575 = shalt.err (!%p1572_p6)
}
  0x2b   : > { %s1740_s21 = smov 64   ;;  %s1741_s24 = smov 4  }
  0x2c   : > { %1451 = dma.hbm_to_vmem [thread:$0]  (!%p1867_p11), %s2187_s4, 256, %s1860_s22, [#allocation7], %s1740_s21, %s1740_s21, %s1741_s24  }
  0x2d   : > { %s1576_s29 = scalar_lea.hbm %s2191_s8, 256 }
  0x2e   : > { %p1577_p2 = scmp.ne.s32.totalorder %s2191_s8, %s1576_s29  ;;  %p1583_p10 = scmp.lt.u32.totalorder %s1576_s29, %s2191_s8 }
  0x30   : > { %p1579_p1 = pnand %p1577_p2, %p1550_p13 }
  0x32   : > { %p1580_p6 = pneg %p1579_p1 }
  0x34   : > { %p1585_p3 = pnand %p1583_p10, %p1580_p6 }
  0x36   : > { %1588 = shalt.err (!%p1585_p3)
}
  0x37   : > { %s1589_s22 = scalar_lea.vmem %s1871_s25, 256  ;;  %p1597_p12 = scmp.lt.s32.totalorder %s1871_s25, %s1871_s25 }
  0x38   : > { %p1590_p5 = scmp.ne.s32.totalorder %s1871_s25, %s1589_s22  ;;  %p1598_p0 = scmp.lt.s32.totalorder %s1589_s22, %s1589_s22 }
  0x3a   : > { %p1592_p7 = pnand %p1590_p5, %p1550_p13  ;;  %p1599_p2 = por %p1598_p0, %p1597_p12 }
  0x3c   : > { %p1593_p9 = pneg %p1592_p7 }
  0x3e   : > { %p1600_p1 = pnand %p1599_p2, %p1593_p9 }
  0x40   : > { %1603 = shalt.err (!%p1600_p1)
}
  0x41   : > { %1454 = dma.hbm_to_vmem [thread:$0]  (!%p1867_p11), %s2191_s8, 256, %s1871_s25, [#allocation7], %s1740_s21, %s1740_s21, %s1741_s24  }
  0x42   : > { %s1926_s27 = sadd.s32 1, %s1736_s15   ;;  %s38_s23 = sadd.s32 1, %s1732_s14 }
  0x43   : > { %s35_s1 = ssub.s32 %s1736_s15, %s1926_s27  ;;  %p45_p13 = scmp.ne.s32.totalorder %s1732_s14, %s1728_s13 }
  0x44   : > { %p36_p6 = scmp.eq.s32.totalorder %s35_s1, 0  ;;  %p46_p10 = scmp.eq.s32.totalorder %s1736_s15, 0 }
  0x45   : > { %p2206_p3 = scmp.eq.s32.totalorder %s1837_s16, 1  ;;  %p1468_p7 = scmp.lt.s32.totalorder %s1736_s15, 2 }
  0x46   : > { %s1942_s29 = scalar_select %p36_p6, %s1732_s14, %s38_s23  }
  0x47   : > { %p1936_p5 = por %p2206_p3, %p45_p13  ;;  %p47_p9 = por %p46_p10, %p45_p13 }
  0x48   : > { %s341_s30 = sand.u32 1, %s1732_s14   ;;  %s1297_s25 = sshll.u32 %s1736_s15, 7 }
  0x49   : > { %s2207_s28 = scalar_select %p1936_p5, 1, 0 }
  0x4a   : > { %s1296_s11 = sshll.u32 %s341_s30, 3  ;;  %s2208_s0 = sld [smem:[#allocation17_spill]] }
  0x4b   : > { %s345_s22 = scalar_lea.vmem [#allocation3], %s1296_s11  ;;  %p1953_p11 = pnand %p1468_p7, %p47_p9 }
  0x4c   : > { %s352_s19 = sshll.u32 %s345_s22, 4  ;;  %s342_s23 = scalar_lea.sflag [#allocation4], %s341_s30  ;;  %s1951_s19 = int_to_ptr.vmem [resolvable:$true] %s352_s19 }
  0x4d   : > { %p1606_p0 = pneg %p1953_p11 }
  0x50   : > { %s1949_s17 = scalar_lea.hbm %s2208_s0, %s1297_s25  ;;  %s1609_s21 = scalar_lea.hbm %s2208_s0, 256 }
  0x51   : > { %s1604_s1 = scalar_lea.hbm %s1949_s17, 128  ;;  %p1610_p13 = scmp.lt.u32.totalorder %s1949_s17, %s2208_s0 }
  0x52   : > { %p1605_p12 = scmp.ne.s32.totalorder %s1949_s17, %s1604_s1  ;;  %p1611_p6 = scmp.lt.u32.totalorder %s1609_s21, %s1604_s1 }
  0x53   : > { %p1613_p3 = scmp.lt.u32.totalorder %s1604_s1, %s1949_s17 }
  0x54   : > { %p1607_p2 = pnand %p1606_p0, %p1605_p12  ;;  %p1612_p10 = por %p1611_p6, %p1610_p13 }
  0x56   : > { %p1608_p1 = pneg %p1607_p2  ;;  %p1614_p7 = por %p1613_p3, %p1612_p10 }
  0x58   : > { %p1615_p9 = pnand %p1614_p7, %p1608_p1 }
  0x5a   : > { %1618 = shalt.err (!%p1615_p9)
}
  0x5b   : > { %s1619_s30 = scalar_lea.vmem %s1951_s19, 128  ;;  %s1742_s25 = smov [#allocation3]  }
  0x5c   : > { %p1620_p12 = scmp.ne.s32.totalorder %s1951_s19, %s1619_s30  ;;  %s1624_s11 = sshll.u32 %s1742_s25, 4  ;;  %s1625_s11 = int_to_ptr.vmem [resolvable:$false] %s1624_s11 }
  0x5d   : > { %s1626_s24 = scalar_lea.vmem %s1625_s11, 256  ;;  %p1627_p4 = scmp.lt.s32.totalorder %s1951_s19, %s1625_s11 }
  0x5e   : > { %p1622_p2 = pnand %p1620_p12, %p1606_p0  ;;  %p1628_p13 = scmp.lt.s32.totalorder %s1626_s24, %s1619_s30 }
  0x60   : > { %p1623_p5 = pneg %p1622_p2  ;;  %p1629_p6 = por %p1628_p13, %p1627_p4 }
  0x62   : > { %p1630_p10 = pnand %p1629_p6, %p1623_p5 }
  0x64   : > { %1633 = shalt.err (!%p1630_p10)
}
  0x65   : > { %1458 = dma.hbm_to_vmem [thread:$0]  (!%p1953_p11), %s1949_s17, 128, %s1951_s19, %s342_s23  }
  0x66   : > { %367 = sbr.rel (%p1856_p8) target bundleno = 1924 (0x784), region = 56  ;;  %s1985_s1 = sand.u32 (!%p1856_p8), 1, %s1728_s13  }
  0x67   : > { %s1988_s21 = sshll.u32 (!%p1856_p8), %s1985_s1, 3  ;;  %s370_s22 = scalar_lea.sflag (!%p1856_p8), [#allocation4], %s1985_s1 }
  0x68   : > { %s373_s30 = scalar_lea.vmem (!%p1856_p8), [#allocation3], %s1988_s21  ;;  %p2210_p4 = scmp.ne.s32.totalorder (!%p1856_p8), %s2201_s18, 0 }
  0x6d   : > { %1707 = dma.done.wait (%p2210_p4), %s370_s22, 128  }
  0x6e   : > { %1709 = vsyncadd (%p2210_p4), %s370_s22, 4294967168  ;;  %p2211_p5 = scmp.eq.s32.totalorder %s1837_s16, 0 }
  0x70   : > { %1711 = dma.done.wait (%p2211_p5), [#allocation7], 512   ;;  %p2212_p8 = pmov %p2211_p5 }
  0x71   : > { %vm431_vm0 = vcmask 261120   ;;  %v2000_v0 = vld [vmem:[%s373_s30] sm:$0xff]  ;;  %v1524_v7 = vld [vmem:[#allocation6] sm:$0xff]   ;;  %v1743_v8 = vmov 0.0   ;;  %vm1744_vm1 = vmmov 0   ;;  %v1525_v9 = vld [vmem:[#allocation6 + $0x8] sm:$0xff]  }
  0x72   : > { %1713 = vsyncadd (%p2212_p8), [#allocation7], 4294966784  ;;  %v432_v1 = vsel %vm431_vm0, %v2000_v0, 0.0  ;;  %1362 = vmatprep.subr.bf16.mxu0 %v1743_v8  ;;  %1366 = vmatprep.mubr.msk.bf16.mxu0 %vm1744_vm1, %v1743_v8  ;;  %s2213_s2 = sld [smem:[#allocation18_spill]]  ;;  %v1305_v16 = vld [vmem:[%s2186_s3] ss:$0 sm:$0xff] }
  0x73   : > { %433 = vadd.xlane.f32.xlu0 %v432_v1  ;;  %1363 = vmatpush3.bf16.msra.mxu0 %v1524_v7  ;;  %v1526_v20 = vld [vmem:[#allocation8] sm:$0xff]   ;;  %v1527_v21 = vld [vmem:[#allocation8 + $0x8] sm:$0xff]   ;;  %v1306_v22 = vld [vmem:[%s2188_s5] ss:$0 sm:$0xff]  ;;  %s1745_s25 = smov 120   ;;  %s1746_s11 = smov 96  }
  0x74   : > { %1370 = vmatprep.subr.bf16.mxu1 %v1743_v8  ;;  %1364 = vmatprep.subr.bf16.mxu0 %v1743_v8  ;;  %s1747_s24 = smov 88   ;;  %s1748_s22 = smov 80   ;;  %vm593_vm2 = vcmask 64512   ;;  %vm656_vm3 = vcmask 1043456   ;;  %vm701_vm4 = vcmask 60416   ;;  %vm820_vm5 = vcmask 126016  }
  0x75   : > { %1374 = vmatprep.mubr.msk.bf16.mxu1 %vm1744_vm1, %v1743_v8  ;;  %1371 = vmatpush3.bf16.msra.mxu1 %v1526_v20  ;;  %s1749_s30 = smov 112   ;;  %s1750_s18 = smov 72   ;;  %vm939_vm6 = vcmask 191616   ;;  %vm1058_vm7 = vcmask 257216  }
  0x76   : > { %1372 = vmatprep.subr.bf16.mxu1 %v1743_v8  ;;  %s1751_s20 = smov 104   ;;  %s425_s17 = scalar_lea.vmem [#allocation10], %s1988_s21 }
  0x77   : > { %1365 = vmatpush3.bf16.msra.mxu0 %v1525_v9  ;;  %s1752_s19 = smov 64   ;;  %s1753_s26 = smov 56  }
  0x78   : > { %1378 = vmatprep.subr.bf16.mxu0 %v1743_v8  ;;  %v1304_v14 = vld [vmem:[%s2213_s2] ss:$0 sm:$0xff]  ;;  %s1754_s23 = smov 48   ;;  %p2214_p0 = scmp.ne.s32.totalorder %s2207_s28, 0 }
  0x79   : > { %1373 = vmatpush3.bf16.msra.mxu1 %v1527_v21 }
  0x7a   : > { %1384 = vmatprep.subr.bf16.mxu1 %v1743_v8 }
 0x100   : > { %v434_v2 = vpop.xlane.xlu0 %433 }
 0x101   : > { %v436_v3 = vmul.f32 0.03125, %v434_v2 }
 0x103   : > { %v437_v4 = vsub.f32 %v2000_v0, %v436_v3 }
 0x105   : > { %v438_v5 = vmul.f32 %v437_v4, %v437_v4 }
 0x107   : > { %v439_v6 = vsel %vm431_vm0, %v438_v5, 0.0 }
 0x108   : > { %440 = vadd.xlane.f32.xlu0 %v439_v6 }
 0x195   : > { %v441_v10 = vpop.xlane.xlu0 %440 }
 0x196   : > { %v442_v11 = vmul.f32 0.03125, %v441_v10 }
 0x198   : > { %v443_v12 = vadd.f32 1e-05, %v442_v11 }
 0x19a   : > { %1530 = vrsqrt.f32 %v443_v12 }
 0x1a4   : > { %v1531_v13 = vpop.eup %1530 }
 0x1a5   : > { %v445_v15 = vmul.f32 %v1531_v13, %v437_v4 }
 0x1a7   : > { %v453_v17 = vmul.f32 %v1304_v14, %v445_v15 }
 0x1a9   : > { %v461_v18 = vadd.f32 %v1305_v16, %v453_v17 }
 0x1ab   : > { %v462_v19 = vpack.c.bf16 %v461_v18, %v461_v18 }
 0x1ad   : > { %1367 = vmatmul.mubr.msk.bf16.vlgmr.msra.gmra.mrb[0].mxu0 %vm431_vm0, %v462_v19 }
 0x1ae   : > { %1380 = vmatprep.mubr.msk.bf16.mxu0 %vm1744_vm1, %v1743_v8 }
 0x280   : > { %v523_v23 = vpop.f32.mrb[0].mxu0 }
 0x281   : > { %v524_v24 = vadd.f32 %v1306_v22, %v523_v23  ;;  %v1368_v25 = vpop.f32.mrb[1].mxu0 }
 0x282   : > { %v526_v26 = vpop.f32.mrb[2].mxu0 }
 0x283   : > { %v2028_v27 = vpack.c.bf16 %v524_v24, %v524_v24  ;;  %v1369_v28 = vpop.f32.mrb[3].mxu0 }
 0x285   : > { %703 = vrot.lane.b32.xlu0 %v2028_v27, %s1745_s25  ;;  %535 = vrot.lane.b32.xlu1 %v2028_v27, %s1746_s11  ;;  %s1755_s25 = smov 40   ;;  %s1756_s11 = smov 8  }
 0x289   : > { %705 = vrot.lane.b32.xlu1 %v2028_v27, %s1747_s24 }
 0x28d   : > { %824 = vrot.lane.b32.xlu1 %v2028_v27, %s1748_s22  ;;  %s1135_s22 = scalar_lea.sflag [#allocation11], %s1985_s1 }
 0x291   : > { %822 = vrot.lane.b32.xlu1 %v2028_v27, %s1749_s30 }
 0x295   : > { %943 = vrot.lane.b32.xlu1 %v2028_v27, %s1750_s18  ;;  %s1759_s18 = smov [#allocation10]  }
 0x299   : > { %941 = vrot.lane.b32.xlu1 %v2028_v27, %s1751_s20  ;;  %s1757_s20 = smov 16  }
 0x2f7   : > { %v536_v29 = vpop.permute.xlu1 %535  ;;  %v704_v34 = vpop.permute.xlu0 %703 }
 0x2f8   : > { %v597_v30 = vsel %vm593_vm2, %v536_v29, 0  ;;  %1375 = vmatmul.mubr.msk.bf16.vlgmr.msra.gmra.mrb[0].mxu1 %vm431_vm0, %v536_v29 }
 0x2f9   : > { %1379 = vmatpush3.bf16.xpose.msra.mxu0 %v597_v30  ;;  %1386 = vmatprep.mubr.msk.bf16.mxu1 %vm1744_vm1, %v1743_v8 }
 0x2fa   : > { %1390 = vmatprep.subr.bf16.mxu0 %v1743_v8 }
 0x2fb   : > { %v706_v31 = vpop.permute.xlu1 %705 }
 0x2fc   : > { %v711_v32 = vsel %vm593_vm2, %v706_v31, 0 }
 0x2ff   : > { %v825_v33 = vpop.permute.xlu1 %824 }
 0x300   : > { %1381 = vmatmul.mubr.msk.bf16.vlgmr.msra.gmra.mrb[4].mxu0 %vm593_vm2, %v2028_v27  ;;  %v830_v36 = vsel %vm593_vm2, %v825_v33, 0 }
 0x301   : > { %1391 = vmatpush3.bf16.xpose.msra.mxu0 %v711_v32  ;;  %1392 = vmatprep.mubr.msk.bf16.mxu0 %vm1744_vm1, %v1743_v8 }
 0x302   : > { %1402 = vmatprep.subr.bf16.mxu0 %v1743_v8 }
 0x303   : > { %v823_v35 = vpop.permute.xlu1 %822 }
 0x307   : > { %v944_v37 = vpop.permute.xlu1 %943 }
 0x308   : > { %1393 = vmatmul.mubr.msk.bf16.vlgmr.msra.gmra.mrb[8].mxu0 %vm593_vm2, %v704_v34  ;;  %v949_v38 = vsel %vm593_vm2, %v944_v37, 0 }
 0x309   : > { %1403 = vmatpush3.bf16.xpose.msra.mxu0 %v830_v36  ;;  %1404 = vmatprep.mubr.msk.bf16.mxu0 %vm1744_vm1, %v1743_v8 }
 0x30a   : > { %1414 = vmatprep.subr.bf16.mxu0 %v1743_v8 }
 0x30b   : > { %v942_v39 = vpop.permute.xlu1 %941 }
 0x310   : > { %1405 = vmatmul.mubr.msk.bf16.vlgmr.msra.gmra.mrb[12].mxu0 %vm593_vm2, %v823_v35 }
 0x311   : > { %1415 = vmatpush3.bf16.xpose.msra.mxu0 %v949_v38  ;;  %1416 = vmatprep.mubr.msk.bf16.mxu0 %vm1744_vm1, %v1743_v8 }
 0x312   : > { %1426 = vmatprep.subr.bf16.mxu0 %v1743_v8 }
 0x318   : > { %1417 = vmatmul.mubr.msk.bf16.vlgmr.msra.gmra.mrb[16].mxu0 %vm593_vm2, %v942_v39 }
 0x319   : > { %1430 = vmatprep.mubr.msk.bf16.mxu0 %vm1744_vm1, %v1743_v8 }
 0x3cb   : > { %v586_v40 = vpop.f32.mrb[0].mxu1 }
 0x3cc   : > { %592 = vst [vmem:[%s425_s17] sm:$0xff] %v586_v40  ;;  %v1376_v41 = vpop.f32.mrb[1].mxu1 }
 0x3cd   : > { %v589_v42 = vpop.f32.mrb[2].mxu1 }
 0x3ce   : > { %v1377_v43 = vpop.f32.mrb[3].mxu1 }
 0x3d3   : > { %v633_v44 = vpop.f32.mrb[4].mxu0 }
 0x3d4   : > { %v1382_v45 = vpop.f32.mrb[5].mxu0  ;;  %v639_v46 = vsel %vm593_vm2, %v633_v44, -inf }
 0x3d5   : > { %640 = vmax.xlane.f32.xlu1 %v639_v46  ;;  %v636_v47 = vpop.f32.mrb[6].mxu0 }
 0x3d6   : > { %v1383_v48 = vpop.f32.mrb[7].mxu0 }
 0x3db   : > { %v747_v49 = vpop.f32.mrb[8].mxu0 }
 0x3dc   : > { %v1394_v50 = vpop.f32.mrb[9].mxu0  ;;  %v753_v51 = vsel %vm593_vm2, %v747_v49, -inf }
 0x3dd   : > { %754 = vmax.xlane.f32.xlu0 %v753_v51  ;;  %v750_v52 = vpop.f32.mrb[10].mxu0 }
 0x3de   : > { %v1395_v53 = vpop.f32.mrb[11].mxu0 }
 0x3e3   : > { %v866_v54 = vpop.f32.mrb[12].mxu0 }
 0x3e4   : > { %v1406_v55 = vpop.f32.mrb[13].mxu0  ;;  %v872_v56 = vsel %vm593_vm2, %v866_v54, -inf }
 0x3e5   : > { %873 = vmax.xlane.f32.xlu1 %v872_v56  ;;  %v869_v57 = vpop.f32.mrb[14].mxu0  ;;  %v1528_v56 = vld [vmem:[%s2189_s6] sm:$0xff]  }
 0x3e6   : > { %v1407_v58 = vpop.f32.mrb[15].mxu0  ;;  %1427 = vmatpush3.bf16.msra.mxu0 %v1528_v56 }
 0x3e7   : > { %v1529_v58 = vld [vmem:[%s2189_s6 + $0x8] sm:$0xff]   ;;  %1428 = vmatprep.subr.bf16.mxu0 %v1743_v8 }
 0x3ea   : > { %1429 = vmatpush3.bf16.msra.mxu0 %v1529_v58 }
 0x3eb   : > { %v985_v59 = vpop.f32.mrb[16].mxu0 }
 0x3ec   : > { %v1418_v60 = vpop.f32.mrb[17].mxu0  ;;  %v991_v61 = vsel %vm593_vm2, %v985_v59, -inf }
 0x3ed   : > { %992 = vmax.xlane.f32.xlu0 %v991_v61  ;;  %v988_v62 = vpop.f32.mrb[18].mxu0 }
 0x3ee   : > { %v1419_v63 = vpop.f32.mrb[19].mxu0 }
 0x462   : > { %v641_v1 = vpop.xlane.xlu1 %640 }
 0x463   : > { %v642_v2 = vsub.f32 %v633_v44, %v641_v1 }
 0x465   : > { %v643_v3 = vmul.f32 1.442695, %v642_v2 }
 0x467   : > { %1532 = vpow2.f32 %v643_v3 }
 0x46a   : > { %v755_v4 = vpop.xlane.xlu0 %754 }
 0x46b   : > { %v756_v5 = vsub.f32 %v747_v49, %v755_v4 }
 0x46d   : > { %v757_v6 = vmul.f32 1.442695, %v756_v5 }
 0x46f   : > { %1534 = vpow2.f32 %v757_v6 }
 0x471   : > { %v1533_v7 = vpop.eup %1532 }
 0x472   : > { %v645_v9 = vsel %vm593_vm2, %v1533_v7, 0.0  ;;  %v874_v17 = vpop.xlane.xlu1 %873 }
 0x473   : > { %646 = vadd.xlane.f32.xlu1 %v645_v9  ;;  %v875_v18 = vsub.f32 %v866_v54, %v874_v17 }
 0x475   : > { %v876_v19 = vmul.f32 1.442695, %v875_v18 }
 0x479   : > { %v1535_v10 = vpop.eup %1534 }
 0x47a   : > { %v993_v11 = vpop.xlane.xlu0 %992  ;;  %v759_v12 = vsel %vm593_vm2, %v1535_v10, 0.0 }
 0x47b   : > { %v994_v13 = vsub.f32 %v985_v59, %v993_v11  ;;  %760 = vadd.xlane.f32.xlu0 %v759_v12 }
 0x47d   : > { %v995_v14 = vmul.f32 1.442695, %v994_v13 }
 0x47f   : > { %1536 = vpow2.f32 %v995_v14 }
 0x480   : > { %1538 = vpow2.f32 %v876_v19 }
 0x484   : > { %651 = vrot.lane.b32.xlu1 %v2028_v27, %s1752_s19  ;;  %s1758_s19 = smov 24  }
 0x489   : > { %v1537_v15 = vpop.eup %1536 }
 0x48a   : > { %v997_v16 = vsel %vm593_vm2, %v1537_v15, 0.0  ;;  %v1539_v20 = vpop.eup %1538 }
 0x48b   : > { %998 = vadd.xlane.f32.xlu0 %v997_v16  ;;  %v878_v21 = vsel %vm593_vm2, %v1539_v20, 0.0 }
 0x4a1   : > { %765 = vrot.lane.b32.xlu0 %v2028_v27, %s1753_s26  ;;  %s1161_s26 = sshll.u32 %s425_s17, 4  ;;  %s2104_s26 = int_to_ptr.vmem [resolvable:$true] %s1161_s26 }
 0x4a2   : > { %s1634_s30 = scalar_lea.vmem %s2104_s26, 128 }
 0x4a3   : > { %p1635_p11 = scmp.ne.s32.totalorder %s2104_s26, %s1634_s30 }
 0x4a5   : > { %p1636_p1 = pnand %p1635_p11, %p2214_p0 }
 0x4a7   : > { %p1637_p3 = pneg %p1636_p1 }
 0x4a8   : > { %879 = vadd.xlane.f32.xlu1 %v878_v21 }
 0x4b9   : > { %884 = vrot.lane.b32.xlu1 %v2028_v27, %s1754_s23  ;;  %s2198_s23 = sshll.u32 %s1837_s16, 7 }
 0x4ba   : > { %s1159_s24 = scalar_lea.hbm %s2193_s10, %s2198_s23 }
 0x4bd   : > { %1003 = vrot.lane.b32.xlu1 %v2028_v27, %s1755_s25 }
 0x500   : > { %v647_v22 = vpop.xlane.xlu1 %646 }
 0x501   : > { %1540 = vrcp.f32 %v647_v22 }
 0x504   : > { %v652_v23 = vpop.permute.xlu1 %651 }
 0x505   : > { %v658_v24 = vsel %vm656_vm3, %v652_v23, 0 }
 0x506   : > { %1385 = vmatpush3.bf16.msra.mxu1 %v658_v24 }
 0x507   : > { %1396 = vmatprep.subr.bf16.mxu1 %v1743_v8 }
 0x508   : > { %v761_v26 = vpop.xlane.xlu0 %760 }
 0x509   : > { %1542 = vrcp.f32 %v761_v26 }
 0x50b   : > { %v1541_v25 = vpop.eup %1540 }
 0x50c   : > { %v649_v28 = vmul.f32 %v1541_v25, %v1533_v7 }
 0x50e   : > { %v650_v29 = vpack.c.bf16 %v649_v28, %v649_v28 }
 0x510   : > { %1387 = vmatmul.mubr.msk.bf16.vlgmr.msra.gmra.mrb[4].mxu1 %vm593_vm2, %v650_v29 }
 0x511   : > { %1398 = vmatprep.mubr.msk.bf16.mxu1 %vm1744_vm1, %v1743_v8 }
 0x513   : > { %v1543_v27 = vpop.eup %1542 }
 0x514   : > { %v763_v31 = vmul.f32 %v1543_v27, %v1535_v10 }
 0x516   : > { %v764_v34 = vpack.c.bf16 %v763_v31, %v763_v31 }
 0x518   : > { %v999_v30 = vpop.xlane.xlu0 %998 }
 0x51c   : > { %v766_v32 = vpop.permute.xlu0 %765 }
 0x51d   : > { %v771_v33 = vsel %vm656_vm3, %v766_v32, 0 }
 0x51e   : > { %1397 = vmatpush3.bf16.msra.mxu1 %v771_v33 }
 0x51f   : > { %1408 = vmatprep.subr.bf16.mxu1 %v1743_v8 }
 0x521   : > { %1399 = vmatmul.mubr.msk.bf16.vlgmr.msra.gmra.mrb[8].mxu1 %vm593_vm2, %v764_v34 }
 0x522   : > { %1410 = vmatprep.mubr.msk.bf16.mxu1 %vm1744_vm1, %v1743_v8 }
 0x535   : > { %v880_v35 = vpop.xlane.xlu1 %879 }
 0x536   : > { %1544 = vrcp.f32 %v880_v35 }
 0x537   : > { %1546 = vrcp.f32 %v999_v30 }
 0x539   : > { %v885_v36 = vpop.permute.xlu1 %884 }
 0x53a   : > { %v890_v37 = vsel %vm656_vm3, %v885_v36, 0 }
 0x53b   : > { %1409 = vmatpush3.bf16.msra.mxu1 %v890_v37 }
 0x53c   : > { %1420 = vmatprep.subr.bf16.mxu1 %v1743_v8 }
 0x53d   : > { %v1004_v40 = vpop.permute.xlu1 %1003 }
 0x53e   : > { %v1009_v43 = vsel %vm656_vm3, %v1004_v40, 0 }
 0x540   : > { %v1545_v38 = vpop.eup %1544 }
 0x541   : > { %v882_v39 = vmul.f32 %v1545_v38, %v1539_v20  ;;  %v1547_v42 = vpop.eup %1546 }
 0x542   : > { %v1001_v44 = vmul.f32 %v1547_v42, %v1537_v15 }
 0x543   : > { %v883_v41 = vpack.c.bf16 %v882_v39, %v882_v39 }
 0x544   : > { %v1002_v45 = vpack.c.bf16 %v1001_v44, %v1001_v44 }
 0x545   : > { %1411 = vmatmul.mubr.msk.bf16.vlgmr.msra.gmra.mrb[12].mxu1 %vm593_vm2, %v883_v41 }
 0x546   : > { %1421 = vmatpush3.bf16.msra.mxu1 %v1009_v43  ;;  %1422 = vmatprep.mubr.msk.bf16.mxu1 %vm1744_vm1, %v1743_v8 }
 0x54d   : > { %1423 = vmatmul.mubr.msk.bf16.vlgmr.msra.gmra.mrb[16].mxu1 %vm593_vm2, %v1002_v45 }
 0x5e3   : > { %v694_v46 = vpop.f32.mrb[4].mxu1 }
 0x5e4   : > { %v700_v47 = vpack.c.bf16 %v694_v46, %v694_v46  ;;  %v1388_v48 = vpop.f32.mrb[5].mxu1 }
 0x5e5   : > { %v697_v49 = vpop.f32.mrb[6].mxu1 }
 0x5e6   : > { %702 = vst.msk [vmem:[#allocation2] sm:$0xf] %vm701_vm4, %v700_v47  ;;  %v1389_v50 = vpop.f32.mrb[7].mxu1 }
 0x5f4   : > { %v807_v51 = vpop.f32.mrb[8].mxu1 }
 0x5f5   : > { %v1334_v52 = vpack.c.bf16 %v807_v51, %v807_v51  ;;  %v1400_v53 = vpop.f32.mrb[9].mxu1 }
 0x5f6   : > { %v810_v54 = vpop.f32.mrb[10].mxu1 }
 0x5f7   : > { %817 = vrot.lane.b32.xlu0 %v1334_v52, %s1756_s11  ;;  %v1401_v55 = vpop.f32.mrb[11].mxu1 }
 0x618   : > { %v926_v57 = vpop.f32.mrb[12].mxu1 }
 0x619   : > { %v1335_v59 = vpack.c.bf16 %v926_v57, %v926_v57  ;;  %v1412_v60 = vpop.f32.mrb[13].mxu1 }
 0x61a   : > { %v929_v61 = vpop.f32.mrb[14].mxu1 }
 0x61b   : > { %936 = vrot.lane.b32.xlu1 %v1335_v59, %s1757_s20  ;;  %v1413_v62 = vpop.f32.mrb[15].mxu1  ;;  %s1638_s20 = sshll.u32 %s1759_s18, 4  ;;  %s1639_s20 = int_to_ptr.vmem [resolvable:$false] %s1638_s20 }
 0x61c   : > { %s1640_s17 = scalar_lea.vmem %s1639_s20, 256  ;;  %p1641_p7 = scmp.lt.s32.totalorder %s2104_s26, %s1639_s20 }
 0x61d   : > { %p1642_p9 = scmp.lt.s32.totalorder %s1640_s17, %s1634_s30 }
 0x61f   : > { %p1643_p12 = por %p1642_p9, %p1641_p7 }
 0x620   : > { %v1045_v63 = vpop.f32.mrb[16].mxu1 }
 0x621   : > { %v1336_v1 = vpack.c.bf16 %v1045_v63, %v1045_v63  ;;  %v1424_v2 = vpop.f32.mrb[17].mxu1  ;;  %p1644_p2 = pnand %p1643_p12, %p1637_p3 }
 0x622   : > { %v1048_v3 = vpop.f32.mrb[18].mxu1 }
 0x623   : > { %1055 = vrot.lane.b32.xlu0 %v1336_v1, %s1758_s19  ;;  %v1425_v4 = vpop.f32.mrb[19].mxu1 }
 0x669   : > { %v818_v5 = vpop.permute.xlu0 %817 }
 0x66a   : > { %821 = vst.msk [vmem:[#allocation2] sm:$0xf] %vm820_vm5, %v818_v5 }
 0x68d   : > { %v937_v8 = vpop.permute.xlu1 %936 }
 0x68e   : > { %940 = vst.msk [vmem:[#allocation2] sm:$0xf] %vm939_vm6, %v937_v8 }
 0x695   : > { %v1056_v6 = vpop.permute.xlu0 %1055 }
 0x696   : > { %1059 = vst.msk [vmem:[#allocation2] sm:$0xf] %vm1058_vm7, %v1056_v6 }
 0x69d   : > { %v1060_v7 = vld [vmem:[#allocation2] sm:$0xf] }
 0x69e   : > { %1431 = vmatmul.mubr.msk.bf16.vlgmr.msra.gmra.mrb[20].mxu0 %vm431_vm0, %v1060_v7 }
 0x69f   : > { %1647 = shalt.err (!%p1644_p2)
}
 0x6a0   : > { %s1648_s19 = scalar_lea.hbm %s1159_s24, 128  ;;  %s1652_s23 = scalar_lea.hbm %s2193_s10, 256 }
 0x6a1   : > { %p1649_p13 = scmp.ne.s32.totalorder %s1159_s24, %s1648_s19  ;;  %p1653_p4 = scmp.lt.u32.totalorder %s1159_s24, %s2193_s10 }
 0x6a2   : > { %p1654_p5 = scmp.lt.u32.totalorder %s1652_s23, %s1648_s19  ;;  %p1656_p11 = scmp.lt.u32.totalorder %s1648_s19, %s1159_s24 }
 0x6a3   : > { %p1650_p6 = pnand %p1649_p13, %p2214_p0 }
 0x6a4   : > { %p1655_p8 = por %p1654_p5, %p1653_p4 }
 0x6a5   : > { %p1651_p10 = pneg %p1650_p6 }
 0x6a6   : > { %p1657_p1 = por %p1656_p11, %p1655_p8 }
 0x6a8   : > { %p1658_p3 = pnand %p1657_p1, %p1651_p10 }
 0x6aa   : > { %1661 = shalt.err (!%p1658_p3)
}
 0x6ab   : > { %1445 = dma.vmem_to_hbm [thread:$0]  (%p2214_p0), %s2104_s26, 128, %s1159_s24, %s1135_s22   ;;  %v1324_v9 = vld [vmem:[%s2190_s7] ss:$0 sm:$0xff] }
 0x6ac   : > { %s418_s0 = scalar_lea.vmem [#allocation9], %s1988_s21  ;;  %s2215_s23 = sshll.u32 %s1837_s16, 7 }
 0x6ad   : > { %s1148_s2 = sshll.u32 %s418_s0, 4  ;;  %s2138_s19 = scalar_lea.hbm %s2192_s9, %s2215_s23  ;;  %s2140_s2 = int_to_ptr.vmem [resolvable:$true] %s1148_s2 }
 0x6ae   : > { %s1130_s21 = scalar_lea.sflag [#allocation5], %s1985_s1  ;;  %s1662_s26 = scalar_lea.vmem %s2140_s2, 128 }
 0x6af   : > { %p1663_p7 = scmp.ne.s32.totalorder %s2140_s2, %s1662_s26  ;;  %s1760_s24 = smov [#allocation9]  }
 0x6b0   : > { %s1666_s16 = sshll.u32 %s1760_s24, 4  ;;  %s1667_s16 = int_to_ptr.vmem [resolvable:$false] %s1666_s16 }
 0x6b1   : > { %p1664_p9 = pnand %p1663_p7, %p2214_p0  ;;  %s1668_s22 = scalar_lea.vmem %s1667_s16, 256 }
 0x6b2   : > { %p1669_p2 = scmp.lt.s32.totalorder %s2140_s2, %s1667_s16  ;;  %p1670_p13 = scmp.lt.s32.totalorder %s1668_s22, %s1662_s26 }
 0x6b3   : > { %p1665_p12 = pneg %p1664_p9 }
 0x6b4   : > { %p1671_p6 = por %p1670_p13, %p1669_p2 }
 0x6b6   : > { %p1672_p10 = pnand %p1671_p6, %p1665_p12 }
 0x771   : > { %v1121_v10 = vpop.f32.mrb[20].mxu0 }
 0x772   : > { %v1122_v11 = vadd.f32 %v1324_v9, %v1121_v10  ;;  %v1432_v12 = vpop.f32.mrb[21].mxu0 }
 0x773   : > { %v1124_v13 = vpop.f32.mrb[22].mxu0 }
 0x774   : > { %v1127_v14 = vadd.f32 %v1122_v11, %v2000_v0  ;;  %v1433_v15 = vpop.f32.mrb[23].mxu0 }
 0x776   : > { %1128 = vst.msk [vmem:[%s418_s0] sm:$0xff] %vm431_vm0, %v1127_v14 }
 0x777   : > { %1675 = shalt.err (!%p1672_p10)
}
 0x778   : > { %s1676_s1 = scalar_lea.hbm %s2138_s19, 128  ;;  %s1680_s30 = scalar_lea.hbm %s2192_s9, 256 }
 0x779   : > { %p1677_p4 = scmp.ne.s32.totalorder %s2138_s19, %s1676_s1  ;;  %p1681_p11 = scmp.lt.u32.totalorder %s2138_s19, %s2192_s9 }
 0x77a   : > { %p1682_p1 = scmp.lt.u32.totalorder %s1680_s30, %s1676_s1  ;;  %p1684_p7 = scmp.lt.u32.totalorder %s1676_s1, %s2138_s19 }
 0x77b   : > { %p1678_p5 = pnand %p1677_p4, %p2214_p0 }
 0x77c   : > { %p1683_p3 = por %p1682_p1, %p1681_p11 }
 0x77d   : > { %p1679_p8 = pneg %p1678_p5 }
 0x77e   : > { %p1685_p9 = por %p1684_p7, %p1683_p3 }
 0x780   : > { %p1686_p12 = pnand %p1685_p9, %p1679_p8 }
 0x782   : > { %1689 = shalt.err (!%p1686_p12)
}
 0x783   : > { %1444 = dma.vmem_to_hbm [thread:$0]  (%p2214_p0), %s2140_s2, 128, %s2138_s19, %s1130_s21  }
 0x784 PF: > { %s2216_s23 = sld [smem:[#allocation16_spill]]  ;;  %s1173_s20 = sand.u32 1, %s1724_s12  }
 0x785   : > { %p2218_p13 = scmp.ge.s32.totalorder %s1736_s15, 2  ;;  %s1174_s17 = scalar_lea.sflag [#allocation5], %s1173_s20 }
 0x78a   : > { %p2217_p2 = scmp.ne.s32.totalorder %s2216_s23, 0 }
 0x78c   : > { %p1460_p6 = pnand %p2218_p13, %p2217_p2 }
 0x78e   : > { %1715 = dma.done.wait (!%p1460_p6), %s1174_s17, 128  }
 0x78f   : > { %1717 = vsyncadd (!%p1460_p6), %s1174_s17, 4294967168  ;;  %s1183_s26 = scalar_lea.sflag [#allocation11], %s1173_s20 }
 0x790   : > { %1719 = dma.done.wait (!%p1460_p6), %s1183_s26, 128  }
 0x791   : > { %1721 = vsyncadd (!%p1460_p6), %s1183_s26, 4294967168  ;;  %p28_p0 = scmp.ge.s32.totalorder %s1926_s27, 4   ;;  %s2219_s12 = smov %s1728_s13 }
 0x792   : > { %s2220_s13 = smov %s1732_s14  ;;  %s2221_s14 = smov %s1942_s29 }
 0x793   : > { %s2222_s15 = smov %s1926_s27  ;;  %30 = sbr.rel (!%p28_p0) target bundleno = 11 (0xb), region = 129 }
 0x79a   :  { %1188 = vsyncpa [#allocation4], 1 }
 0x79b   :  { %1190 = vsyncpa [#allocation4 + $0x1], 1 }
 0x79c   :  { %1191 = vsyncpa [#allocation7], 1 }
 0x79d   :  { %1192 = vsyncpa [#allocation5], 1 }
 0x79e   :  { %1194 = vsyncpa [#allocation5 + $0x1], 1 }
 0x79f   :  { %1195 = vsyncpa [#allocation11], 1 }
 0x7a0   :  { %1197 = vsyncpa [#allocation11 + $0x1], 1 }

</bundles_post_ra>
